<compile_context>
chip_gen: v7x
topology: tpu7x:2x2x1
jax: 0.10.0
libtpu: 0.0.40
codegen_flags: <defaults>
</compile_context>

<pallas_src>
import functools

import jax
import jax.numpy as jnp
from jax.experimental import pallas as pl
from jax.experimental.pallas import tpu as pltpu

LANE = 128


def _round_up(v, m):
    return ((v + m - 1) // m) * m


def _temporal_conv_kernel(x_ref, w_ref, b_ref, o_ref, *, kt, tt, n_nodes,
                          cout_pad, activation):
    """One (batch, time-tile) grid step.

    x_ref: (1, T_pad*N, Cin)   bf16 — whole (padded) time axis of this batch;
                               block index is constant across time tiles, so it
                               is DMA'd from HBM only once per batch.
    w_ref: (kt, Cin, C2_pad)   bf16 — per-tap conv weights, TCA folded into the
                               kt-1 tap, lane-padded to 128 multiples.
    b_ref: (1, C2_pad)         f32  — effective bias.
    o_ref: (1, tt*N, Cout_pad) f32  — lane-dense output tile.
    """
    j = pl.program_id(1)
    rows = tt * n_nodes

    # Temporal unfold in VMEM: kt accumulated matmuls over shifted row windows
    # (no kt x HBM blow-up, single f32 accumulator).
    start = pl.multiple_of((j * tt) * n_nodes, n_nodes)
    acc = jnp.dot(x_ref[0, pl.ds(start, rows), :], w_ref[0],
                  preferred_element_type=jnp.float32)
    for k in range(1, kt):
        start = pl.multiple_of((j * tt + k) * n_nodes, n_nodes)
        acc += jnp.dot(x_ref[0, pl.ds(start, rows), :], w_ref[k],
                       preferred_element_type=jnp.float32)
    acc = acc + b_ref[...]

    if activation == 'GLU':
        # p / q halves are each 128-lane aligned -> vreg-boundary slice, no relayout.
        p = acc[:, :cout_pad]
        q = acc[:, cout_pad:]
        out = p * jax.nn.sigmoid(q)
    elif activation == 'sigmoid':
        out = jax.nn.sigmoid(acc)
    elif activation == 'relu':
        out = jnp.maximum(acc, 0.0)
    else:
        raise ValueError('No such activation')
    o_ref[0] = out.astype(o_ref.dtype)


def init_temporal_conv_params(key, kt, in_channels, out_channels, activation='GLU'):
    """Deterministic parameter init matching the PyTorch module's shapes."""
    c2 = 2 * out_channels if activation == 'GLU' else out_channels
    k_conv_w, k_conv_b, k_tca_w, k_tca_b = jax.random.split(key, 4)
    scale = 1.0 / jnp.sqrt(in_channels * kt)
    params = {
        # nn.Conv2d(in_channels, c2, kernel_size=(1, kt)) -> weight [c2, in, 1, kt]
        'conv_w': jax.random.uniform(k_conv_w, (c2, in_channels, 1, kt),
                                     jnp.float32, -scale, scale),
        'conv_b': jax.random.uniform(k_conv_b, (c2,), jnp.float32, -scale, scale),
    }
    if in_channels > out_channels:
        # TemporalChannelAlign uses its Conv2d(in, out, (1,1)) only in this case.
        s2 = 1.0 / jnp.sqrt(in_channels)
        params['tca_w'] = jax.random.uniform(k_tca_w, (out_channels, in_channels, 1, 1),
                                             jnp.float32, -s2, s2)
        params['tca_b'] = jax.random.uniform(k_tca_b, (out_channels,), jnp.float32, -s2, s2)
    return params


def _build_effective_weights(params, *, kt, in_channels, out_channels, activation):
    """Fold Conv2d(1,kt) + TemporalChannelAlign into lane-padded per-tap operands.

    Returns w_eff [kt, Cin, C2_pad] (bf16) and b_eff [1, C2_pad] (f32).
    TCA acts on x[:, kt-1:], i.e. exactly the k = kt-1 tap, so its matrix
    (1x1 conv / identity / zero-pad) and bias fold into w_eff[kt-1] / b_eff.
    """
    Cin, Cout = in_channels, out_channels
    cout_pad = _round_up(Cout, LANE)
    glu = activation == 'GLU'
    c2_pad = 2 * cout_pad if glu else cout_pad

    w = jnp.transpose(params['conv_w'][:, :, 0, :], (2, 1, 0)).astype(jnp.float32)  # [kt, Cin, c2]
    b = params['conv_b'].astype(jnp.float32)                                        # [c2]

    w_eff = jnp.zeros((kt, Cin, c2_pad), jnp.float32)
    b_eff = jnp.zeros((1, c2_pad), jnp.float32)
    w_eff = w_eff.at[:, :, :Cout].set(w[:, :, :Cout])          # p half (or whole conv)
    b_eff = b_eff.at[0, :Cout].set(b[:Cout])
    if glu:
        w_eff = w_eff.at[:, :, cout_pad:cout_pad + Cout].set(w[:, :, Cout:])  # q half
        b_eff = b_eff.at[0, cout_pad:cout_pad + Cout].set(b[Cout:])

    if activation != 'sigmoid':          # the 'sigmoid' branch never uses TCA
        if Cin > Cout:
            w_tca = params['tca_w'][:, :, 0, 0].T.astype(jnp.float32)   # [Cin, Cout]
            b_tca = params['tca_b'].astype(jnp.float32)
        else:                            # identity (Cin == Cout) or zero-pad (Cin < Cout)
            w_tca = jnp.eye(Cin, Cout, dtype=jnp.float32)
            b_tca = jnp.zeros((Cout,), jnp.float32)
        w_eff = w_eff.at[kt - 1, :, :Cout].add(w_tca)
        b_eff = b_eff.at[0, :Cout].add(b_tca)
    return w_eff.astype(jnp.bfloat16), b_eff


def temporal_conv_forward(x, params, *, kt, in_channels, out_channels,
                          activation='GLU', row_tile=2048):
    """x: [B, T, N, Cin] -> [B, T-kt+1, N, out_channels] (f32)."""
    B, T, N, Cin = x.shape
    assert Cin == in_channels and T >= kt
    Cout = out_channels
    T_out = T - kt + 1
    cout_pad = _round_up(Cout, LANE)
    c2_pad = 2 * cout_pad if activation == 'GLU' else cout_pad

    # --- choose the time tile: big row tiles amortize per-grid-step overhead,
    #     capped so double-buffered output tiles stay well inside v7x's VMEM.
    max_rows = max(8, (12 << 20) // (cout_pad * 4))
    tt = max(1, min(row_tile, max_rows) // N)
    tt = min(tt, T_out)
    while tt < T_out and (tt * N) % 8 != 0:   # sublane alignment when time is tiled
        tt += 1
    TJ = -(-T_out // tt)
    T_out_pad = TJ * tt
    T_pad = T_out_pad + kt - 1
    rows = tt * N

    # --- single bf16 cast (+ optional zero time-pad); NO kt x unfold in HBM.
    xb = x.astype(jnp.bfloat16)
    if T_pad != T:
        xb = jnp.pad(xb, ((0, 0), (0, T_pad - T), (0, 0), (0, 0)))
    x3 = xb.reshape(B, T_pad * N, Cin)

    w_eff, b_eff = _build_effective_weights(
        params, kt=kt, in_channels=in_channels, out_channels=out_channels,
        activation=activation)

    kernel = functools.partial(_temporal_conv_kernel, kt=kt, tt=tt, n_nodes=N,
                               cout_pad=cout_pad, activation=activation)

    # VMEM budget: double-buffered x slab + output tile + weights, with headroom.
    x_blk = T_pad * N * Cin * 2
    o_blk = rows * cout_pad * 4
    w_blk = kt * Cin * c2_pad * 2 + c2_pad * 4
    vmem_limit = int(min(max(2 * (x_blk + o_blk + w_blk) + (4 << 20), 32 << 20),
                         56 << 20))

    out_padded = pl.pallas_call(
        kernel,
        out_shape=jax.ShapeDtypeStruct((B, T_out_pad * N, cout_pad), jnp.float32),
        grid_spec=pltpu.PrefetchScalarGridSpec(
            num_scalar_prefetch=0,
            grid=(B, TJ),
            in_specs=[
                # whole (padded) time axis of one batch; block index is constant
                # across j, so the slab is fetched from HBM once per batch.
                pl.BlockSpec((1, T_pad * N, Cin), lambda b, j: (b, 0, 0)),
                pl.BlockSpec((kt, Cin, c2_pad), lambda b, j: (0, 0, 0)),
                pl.BlockSpec((1, c2_pad), lambda b, j: (0, 0)),
            ],
            out_specs=pl.BlockSpec((1, rows, cout_pad), lambda b, j: (b, j, 0)),
        ),
        compiler_params=pltpu.CompilerParams(
            dimension_semantics=("parallel", "parallel"),
            vmem_limit_bytes=vmem_limit),
    )(x3, w_eff, b_eff)

    out = out_padded.reshape(B, T_out_pad, N, cout_pad)[:, :T_out, :, :Cout]
    return out


def _reference_forward(x, params, *, kt, in_channels, out_channels, activation='GLU'):
    """Pure-JAX f32 reference replicating the PyTorch forward semantics."""
    B, T, N, Cin = x.shape
    T_out = T - kt + 1
    x_unf = jnp.stack([x[:, k:k + T_out] for k in range(kt)], axis=3)  # [B,T_out,N,kt,Cin]
    w = params['conv_w'][:, :, 0, :]                                   # [c2, Cin, kt]
    conv = jnp.einsum('btnkc,ock->btno', x_unf, w) + params['conv_b']
    x_s = x[:, kt - 1:]                                                # [B,T_out,N,Cin]
    if in_channels > out_channels:
        tca = jnp.einsum('btnc,oc->btno', x_s, params['tca_w'][:, :, 0, 0]) + params['tca_b']
    elif in_channels < out_channels:
        tca = jnp.concatenate(
            [x_s, jnp.zeros((B, T_out, N, out_channels - in_channels), x.dtype)], axis=-1)
    else:
        tca = x_s
    if activation == 'GLU':
        p, q = conv[..., :out_channels], conv[..., out_channels:]
        return (p + tca) * jax.nn.sigmoid(q)
    elif activation == 'sigmoid':
        return jax.nn.sigmoid(conv)
    elif activation == 'relu':
        return jnp.maximum(conv + tca, 0.0)
    raise ValueError('No such activation')


if __name__ == "__main__":
    key = jax.random.PRNGKey(0)

    configs = [
        # (B, T, N, kt, Cin, Cout, activation, row_tile)
        (2, 8, 16, 3, 4, 8, 'GLU', 2048),      # Cin < Cout (zero-pad TCA), single time tile
        (2, 8, 16, 3, 4, 8, 'GLU', 64),        # same math, multi time-tile path (TJ=2)
        (2, 8, 16, 3, 8, 4, 'relu', 2048),     # Cin > Cout (1x1-conv TCA folded into tap kt-1)
        (2, 8, 16, 2, 4, 4, 'sigmoid', 2048),  # no TCA path at all
    ]
    for (B, T, N, kt, Cin, Cout, act, row_tile) in configs:
        key, k_x, k_p = jax.random.split(key, 3)
        x = jax.random.normal(k_x, (B, T, N, Cin), jnp.float32)
        params = init_temporal_conv_params(k_p, kt, Cin, Cout, act)

        fwd = jax.jit(functools.partial(
            temporal_conv_forward, kt=kt, in_channels=Cin, out_channels=Cout,
            activation=act, row_tile=row_tile))
        out = jax.block_until_ready(fwd(x, params))

        # Reference: f32 module semantics on the same bf16-quantized input
        # (the kernel feeds the MXU bf16 activations/weights, f32 accumulate).
        x_q = x.astype(jnp.bfloat16).astype(jnp.float32)
        ref = _reference_forward(x_q, params, kt=kt, in_channels=Cin,
                                 out_channels=Cout, activation=act)
        assert out.shape == (B, T - kt + 1, N, Cout), out.shape
        err = float(jnp.max(jnp.abs(out - ref)))
        assert jnp.allclose(out, ref, atol=2e-2, rtol=2e-2), (act, err)

    print("KERNEL_OK")
</pallas_src>

<mosaic_0001>
module attributes {stable_mosaic.version = 11 : i64} {
  func.func @_temporal_conv_kernel(%arg0: i32, %arg1: i32, %arg2: memref<1x128x4xbf16, #tpu.memory_space<vmem>>, %arg3: memref<3x4x256xbf16, #tpu.memory_space<vmem>>, %arg4: memref<1x256xf32, #tpu.memory_space<vmem>>, %arg5: memref<1x96x128xf32, #tpu.memory_space<vmem>>) attributes {dimension_semantics = [#tpu.dimension_semantics<parallel>, #tpu.dimension_semantics<parallel>], iteration_bounds = array<i64: 2, 1>, scalar_prefetch = 0 : i64, scratch_operands = 0 : i64, tpu.core_type = #tpu.core_type<tc>, window_params = [{transform_indices = @transform_0, window_bounds = array<i64: 1, 128, 4>}, {pipeline_mode = #tpu.pipeline_mode<synchronous>, transform_indices = @transform_1, window_bounds = array<i64: 3, 4, 256>}, {pipeline_mode = #tpu.pipeline_mode<synchronous>, transform_indices = @transform_2, window_bounds = array<i64: 1, 256>}, {transform_indices = @transform_3, window_bounds = array<i64: 1, 96, 128>}]} {
    %c6_i32 = arith.constant 6 : i32
    %0 = arith.muli %arg1, %c6_i32 : i32
    %c16_i32 = arith.constant 16 : i32
    %1 = arith.muli %0, %c16_i32 : i32
    %2 = tpu.assume_multiple %1, 16 : i32
    %c0 = arith.constant 0 : index
    %3 = arith.index_cast %2 : i32 to index
    %c0_0 = arith.constant 0 : index
    %4 = vector.load %arg2[%c0, %3, %c0_0] : memref<1x128x4xbf16, #tpu.memory_space<vmem>>, vector<1x96x4xbf16>
    %5 = vector.shape_cast %4 : vector<1x96x4xbf16> to vector<96x4xbf16>
    %c0_1 = arith.constant 0 : index
    %c0_2 = arith.constant 0 : index
    %c0_3 = arith.constant 0 : index
    %6 = vector.load %arg3[%c0_1, %c0_2, %c0_3] : memref<3x4x256xbf16, #tpu.memory_space<vmem>>, vector<1x4x256xbf16>
    %7 = vector.shape_cast %6 : vector<1x4x256xbf16> to vector<4x256xbf16>
    %cst = arith.constant dense<0.000000e+00> : vector<96x256xf32>
    %8 = tpu.matmul %5, %7, %cst {dimension_numbers = #tpu.dot_dimension_numbers<[1], [0], [0], [1], [0, 0, 1, 1], [], []>} : vector<96x4xbf16>, vector<4x256xbf16>, vector<96x256xf32> -> vector<96x256xf32>
    %c6_i32_4 = arith.constant 6 : i32
    %9 = arith.muli %arg1, %c6_i32_4 : i32
    %c1_i32 = arith.constant 1 : i32
    %10 = arith.addi %9, %c1_i32 : i32
    %c16_i32_5 = arith.constant 16 : i32
    %11 = arith.muli %10, %c16_i32_5 : i32
    %12 = tpu.assume_multiple %11, 16 : i32
    %c0_6 = arith.constant 0 : index
    %13 = arith.index_cast %12 : i32 to index
    %c0_7 = arith.constant 0 : index
    %14 = vector.load %arg2[%c0_6, %13, %c0_7] : memref<1x128x4xbf16, #tpu.memory_space<vmem>>, vector<1x96x4xbf16>
    %15 = vector.shape_cast %14 : vector<1x96x4xbf16> to vector<96x4xbf16>
    %c1 = arith.constant 1 : index
    %c0_8 = arith.constant 0 : index
    %c0_9 = arith.constant 0 : index
    %16 = vector.load %arg3[%c1, %c0_8, %c0_9] : memref<3x4x256xbf16, #tpu.memory_space<vmem>>, vector<1x4x256xbf16>
    %17 = vector.shape_cast %16 : vector<1x4x256xbf16> to vector<4x256xbf16>
    %cst_10 = arith.constant dense<0.000000e+00> : vector<96x256xf32>
    %18 = tpu.matmul %15, %17, %cst_10 {dimension_numbers = #tpu.dot_dimension_numbers<[1], [0], [0], [1], [0, 0, 1, 1], [], []>} : vector<96x4xbf16>, vector<4x256xbf16>, vector<96x256xf32> -> vector<96x256xf32>
    %19 = arith.addf %8, %18 : vector<96x256xf32>
    %c6_i32_11 = arith.constant 6 : i32
    %20 = arith.muli %arg1, %c6_i32_11 : i32
    %c2_i32 = arith.constant 2 : i32
    %21 = arith.addi %20, %c2_i32 : i32
    %c16_i32_12 = arith.constant 16 : i32
    %22 = arith.muli %21, %c16_i32_12 : i32
    %23 = tpu.assume_multiple %22, 16 : i32
    %c0_13 = arith.constant 0 : index
    %24 = arith.index_cast %23 : i32 to index
    %c0_14 = arith.constant 0 : index
    %25 = vector.load %arg2[%c0_13, %24, %c0_14] : memref<1x128x4xbf16, #tpu.memory_space<vmem>>, vector<1x96x4xbf16>
    %26 = vector.shape_cast %25 : vector<1x96x4xbf16> to vector<96x4xbf16>
    %c2 = arith.constant 2 : index
    %c0_15 = arith.constant 0 : index
    %c0_16 = arith.constant 0 : index
    %27 = vector.load %arg3[%c2, %c0_15, %c0_16] : memref<3x4x256xbf16, #tpu.memory_space<vmem>>, vector<1x4x256xbf16>
    %28 = vector.shape_cast %27 : vector<1x4x256xbf16> to vector<4x256xbf16>
    %cst_17 = arith.constant dense<0.000000e+00> : vector<96x256xf32>
    %29 = tpu.matmul %26, %28, %cst_17 {dimension_numbers = #tpu.dot_dimension_numbers<[1], [0], [0], [1], [0, 0, 1, 1], [], []>} : vector<96x4xbf16>, vector<4x256xbf16>, vector<96x256xf32> -> vector<96x256xf32>
    %30 = arith.addf %19, %29 : vector<96x256xf32>
    %c0_18 = arith.constant 0 : index
    %c0_19 = arith.constant 0 : index
    %31 = vector.load %arg4[%c0_18, %c0_19] : memref<1x256xf32, #tpu.memory_space<vmem>>, vector<1x256xf32>
    %32 = vector.broadcast %31 : vector<1x256xf32> to vector<96x256xf32>
    %33 = arith.addf %30, %32 : vector<96x256xf32>
    %34 = vector.extract_strided_slice %33 {offsets = [0, 0], sizes = [96, 128], strides = [1, 1]} : vector<96x256xf32> to vector<96x128xf32>
    %35 = vector.extract_strided_slice %33 {offsets = [0, 128], sizes = [96, 128], strides = [1, 1]} : vector<96x256xf32> to vector<96x128xf32>
    %36 = arith.negf %35 : vector<96x128xf32>
    %37 = math.exp %36 : vector<96x128xf32>
    %cst_20 = arith.constant 1.000000e+00 : f32
    %38 = vector.broadcast %cst_20 : f32 to vector<96x128xf32>
    %39 = arith.addf %38, %37 : vector<96x128xf32>
    %40 = arith.divf %38, %39 : vector<96x128xf32>
    %41 = arith.mulf %34, %40 : vector<96x128xf32>
    %c0_21 = arith.constant 0 : index
    %c0_22 = arith.constant 0 : index
    %c0_23 = arith.constant 0 : index
    %42 = vector.load %arg5[%c0_21, %c0_22, %c0_23] : memref<1x96x128xf32, #tpu.memory_space<vmem>>, vector<1x96x128xf32>
    %43 = vector.shape_cast %42 : vector<1x96x128xf32> to vector<96x128xf32>
    %44 = vector.shape_cast %41 : vector<96x128xf32> to vector<1x96x128xf32>
    tpu.vector_store %arg5[%c0_21, %c0_22, %c0_23], %44 {strides = array<i32>} : memref<1x96x128xf32, #tpu.memory_space<vmem>>, vector<1x96x128xf32>,
    return
  }
  func.func @transform_0(%arg0: i32, %arg1: i32) -> (i32, i32, i32) {
    %c0_i32 = arith.constant 0 : i32
    %c0_i32_0 = arith.constant 0 : i32
    %c0_i32_1 = arith.constant 0 : i32
    return %arg0, %c0_i32, %c0_i32_0 : i32, i32, i32
  }
  func.func @transform_1(%arg0: i32, %arg1: i32) -> (i32, i32, i32) {
    %c0_i32 = arith.constant 0 : i32
    %c0_i32_0 = arith.constant 0 : i32
    %c0_i32_1 = arith.constant 0 : i32
    %c0_i32_2 = arith.constant 0 : i32
    return %c0_i32, %c0_i32_0, %c0_i32_1 : i32, i32, i32
  }
  func.func @transform_2(%arg0: i32, %arg1: i32) -> (i32, i32) {
    %c0_i32 = arith.constant 0 : i32
    %c0_i32_0 = arith.constant 0 : i32
    %c0_i32_1 = arith.constant 0 : i32
    return %c0_i32, %c0_i32_0 : i32, i32
  }
  func.func @transform_3(%arg0: i32, %arg1: i32) -> (i32, i32, i32) {
    %c0_i32 = arith.constant 0 : i32
    %c0_i32_0 = arith.constant 0 : i32
    return %arg0, %arg1, %c0_i32 : i32, i32, i32
  }
}

</mosaic_0001>

<bundles_post_ra>
// kernel: temporal_conv_forward.1
= control target key start
LH: loop header
LB: loop body
LE: loop exit
PB: predicated region body
PF: predicated region fallthrough
CT: control target
= control target key end

     0   :  { %s1245_s12 = smov 0   ;;  %s1247_s13 = smov 0   ;;  %s1429_s0 = inlined_call_operand.vmem [shape: bf16[2,128,4], index: 0, kind: input, shape index: {}]   ;;  %s1430_s1 = inlined_call_operand.vmem [shape: bf16[3,4,256], index: 1, kind: input, shape index: {}]   ;;  %s1431_s2 = inlined_call_operand.vmem [shape: f32[1,256], index: 2, kind: input, shape index: {}]   ;;  %s1432_s3 = inlined_call_operand.vmem [shape: f32[2,96,128], index: 3, kind: output, shape index: {}]  }
   0x1   :  { %s1249_s14 = smov 0  }
   0x2 LB: > { %s25_s15 = sadd.s32 1, %s1218_s13  ;;  %p971_p0 = scmp.ge.s32.totalorder %s1222_s14, 1  ;;  %s1222_s14 = sphi %s1249_s14, %s13_s14   ;;  %s1218_s13 = sphi %s1247_s13, %s1434_s13   ;;  %s1214_s12 = sphi %s1245_s12, %s1433_s12  }
   0x3   : > { %p27_p1 = scmp.ge.s32.totalorder %s25_s15, 2  ;;  %p151_p2 = scmp.lt.s32.totalorder %s1222_s14, 3 }
   0x5   : > { %s1436_s15 = smov (%p27_p1, %s25_s15), 0  ;;  %p152_p3 = pnand %p971_p0, %p151_p2 }
   0x6   : > { %v994_v0 = vld.sshfl [vmem:[%s1430_s1 + $0x4] sm:$0x33 pattern:$0x76325410] (!%p152_p3)  ;;  %vm292_vm0 = vcmask (!%p152_p3), 1041408   ;;  %v1224_v4 = vmov (!%p152_p3), 0   ;;  %v750_v36 = vlaneseq (!%p152_p3) }
   0x7   : > { %155 = sbr.rel (%p152_p3) target bundleno = 331 (0x14b), region = 32  ;;  %v272_v1 = vcombine.high (!%p152_p3), %v994_v0, %v994_v0  ;;  %v1008_v2 = vld.sshfl [vmem:[%s1430_s1] sm:$0x33 pattern:$0x76325410] (!%p152_p3)  ;;  %v294_v3 = vsel (!%p152_p3), %vm292_vm0, %v994_v0, 0  ;;  %331 = vmatprep.mubr.bf16.mxu1 (!%p152_p3), %v1224_v4  ;;  %487 = vmatprep.mubr.bf16.mxu0 (!%p152_p3), %v1224_v4 }
   0x8   : > { %p179_p4 = scmp.lt.s32.totalorder (!%p152_p3), %s1214_s12, 1  ;;  %v430_v5 = vcombine.high (!%p152_p3), %v1008_v2, %v1008_v2  ;;  %v450_v6 = vsel (!%p152_p3), %vm292_vm0, %v1008_v2, 0  ;;  %v1035_v7 = vld.sshfl [vmem:[%s1430_s1 + $0x8] sm:$0x33 pattern:$0x76325410] (!%p152_p3) }
   0x9   : > { %995 = vmatprep.subr.msk.bf16.mxu1 (!%p152_p3), %vm292_vm0, %v272_v1  ;;  %v606_v8 = vcombine.high (!%p152_p3), %v1035_v7, %v1035_v7  ;;  %vm273_vm1 = vcmask (!%p152_p3), 31744   ;;  %v626_v11 = vsel (!%p152_p3), %vm292_vm0, %v1035_v7, 0  ;;  %v751_v39 = vshrl.u32 (!%p152_p3), %v750_v36, 7  ;;  %v748_v43 = vld [vmem:[%s1431_s2] sm:$0x3] (!%p152_p3) }
   0xa   : > { %1009 = vmatprep.subr.msk.bf16.mxu0 (!%p152_p3), %vm292_vm0, %v430_v5  ;;  %300 = vmatpush1.bf16.msra.mxu1 (!%p152_p3), %v294_v3 }
   0xb   : > { %456 = vmatpush1.bf16.msra.mxu0 (!%p152_p3), %v450_v6  ;;  %1058 = vmatprep.subr.msk.bf16.mxu1 (!%p152_p3), %vm292_vm0, %v430_v5  ;;  %v756_v42 = vsub.s32 (!%p152_p3), 1, %v751_v39 }
   0xc   : > { %1036 = vmatprep.subr.msk.bf16.mxu0 (!%p152_p3), %vm292_vm0, %v606_v8 }
   0xd   : > { %v1344_v45 = vrot.slane (!%p152_p3), %v748_v43, %v756_v42 }
   0xe   : > { %s1438_s12 = smov (!%p179_p4, %s1214_s12), 1 }
   0xf   : > { %s1057_s22 = sshll.u32 %s1438_s12, 6  ;;  %s1108_s28 = smul.u32 96, %s1438_s12 }
  0x10   : > { %s1286_s25 = scalar_lea.vmem %s1429_s0, %s1057_s22 }
  0x11   : > { %v1134_v9 = vld [vmem:[%s1286_s25 + $0x8] sm:$0xff]   ;;  %v1135_v10 = vld [vmem:[%s1286_s25] sm:$0xff]   ;;  %v1136_v12 = vld [vmem:[%s1286_s25 + $0x10] sm:$0xff]   ;;  %s1378_s4 = scalar_lea.vmem %s1432_s3, %s1108_s28 }
  0x12   : > { %996 = vmatmul.mubr.msk.bf16.vlgmr.msra.gmra.mrb[0].mxu1 %vm273_vm1, %v1134_v9  ;;  %1010 = vmatmul.mubr.msk.bf16.vlgmr.msra.gmra.mrb[0].mxu0 %vm273_vm1, %v1135_v10  ;;  %v1137_v13 = vld [vmem:[%s1286_s25 + $0x8] sm:$0xff]   ;;  %v1138_v14 = vld [vmem:[%s1286_s25 + $0x18] sm:$0xff]   ;;  %v1139_v15 = vld [vmem:[%s1286_s25 + $0x10] sm:$0xff]  }
  0x13   : > { %1059 = vmatpush1.bf16.msra.mxu1 %v450_v6  ;;  %632 = vmatpush1.bf16.msra.mxu0 %v626_v11  ;;  %v1140_v16 = vld [vmem:[%s1286_s25 + $0x20] sm:$0xff]   ;;  %v1141_v17 = vld [vmem:[%s1286_s25 + $0x10] sm:$0xff]   ;;  %v1142_v18 = vld [vmem:[%s1286_s25 + $0x28] sm:$0xff]  }
  0x14   : > { %341 = vmatprep.mubr.bf16.mxu1 %v1224_v4  ;;  %497 = vmatprep.mubr.bf16.mxu0 %v1224_v4  ;;  %v1143_v19 = vld [vmem:[%s1286_s25 + $0x18] sm:$0xff]   ;;  %v1144_v20 = vld [vmem:[%s1286_s25 + $0x30] sm:$0xff]   ;;  %v1145_v21 = vld [vmem:[%s1286_s25 + $0x20] sm:$0xff]  }
  0x15   : > { %v1146_v22 = vld [vmem:[%s1286_s25 + $0x18] sm:$0xff]   ;;  %v1147_v23 = vld [vmem:[%s1286_s25 + $0x28] sm:$0xff]   ;;  %v1148_v24 = vld [vmem:[%s1286_s25 + $0x20] sm:$0xff]  }
  0x16   : > { %v1149_v25 = vld [vmem:[%s1286_s25 + $0x30] sm:$0xff]   ;;  %v1150_v26 = vld [vmem:[%s1286_s25 + $0x28] sm:$0xff]   ;;  %v1151_v27 = vld [vmem:[%s1286_s25 + $0x38] sm:$0xff]  }
  0x1a   : > { %997 = vmatmul.mubr.msk.bf16.gmra.mrb[4].mxu1 %vm273_vm1, %v1136_v12  ;;  %1011 = vmatmul.mubr.msk.bf16.gmra.mrb[4].mxu0 %vm273_vm1, %v1137_v13 }
  0x1b   : > { %351 = vmatprep.mubr.bf16.mxu1 %v1224_v4  ;;  %507 = vmatprep.mubr.bf16.mxu0 %v1224_v4 }
  0x22   : > { %998 = vmatmul.mubr.msk.bf16.gmra.mrb[8].mxu1 %vm273_vm1, %v1138_v14  ;;  %1012 = vmatmul.mubr.msk.bf16.gmra.mrb[8].mxu0 %vm273_vm1, %v1139_v15 }
  0x23   : > { %361 = vmatprep.mubr.bf16.mxu1 %v1224_v4  ;;  %663 = vmatprep.mubr.bf16.mxu0 %v1224_v4 }
  0x2a   : > { %999 = vmatmul.mubr.msk.bf16.gmra.mrb[12].mxu1 %vm273_vm1, %v1140_v16  ;;  %1037 = vmatmul.mubr.msk.bf16.vlgmr.msra.gmra.mrb[0].mxu0 %vm273_vm1, %v1141_v17 }
  0x2b   : > { %371 = vmatprep.mubr.bf16.mxu1 %v1224_v4  ;;  %673 = vmatprep.mubr.bf16.mxu0 %v1224_v4 }
  0x32   : > { %1000 = vmatmul.mubr.msk.bf16.gmra.mrb[16].mxu1 %vm273_vm1, %v1142_v18  ;;  %1038 = vmatmul.mubr.msk.bf16.gmra.mrb[4].mxu0 %vm273_vm1, %v1143_v19  ;;  %v752_v18 = vsub.s32 0, %v751_v39 }
  0x33   : > { %381 = vmatprep.mubr.bf16.mxu1 %v1224_v4  ;;  %683 = vmatprep.mubr.bf16.mxu0 %v1224_v4 }
  0x3a   : > { %1001 = vmatmul.mubr.msk.bf16.gmra.mrb[20].mxu1 %vm273_vm1, %v1144_v20  ;;  %1039 = vmatmul.mubr.msk.bf16.gmra.mrb[8].mxu0 %vm273_vm1, %v1145_v21 }
  0x3b   : > { %517 = vmatprep.mubr.bf16.mxu1 %v1224_v4  ;;  %693 = vmatprep.mubr.bf16.mxu0 %v1224_v4 }
  0x42   : > { %1013 = vmatmul.mubr.msk.bf16.vlgmr.msra.gmra.mrb[12].mxu1 %vm273_vm1, %v1146_v22  ;;  %1040 = vmatmul.mubr.msk.bf16.gmra.mrb[12].mxu0 %vm273_vm1, %v1147_v23 }
  0x43   : > { %527 = vmatprep.mubr.bf16.mxu1 %v1224_v4  ;;  %703 = vmatprep.mubr.bf16.mxu0 %v1224_v4 }
  0x4a   : > { %1014 = vmatmul.mubr.msk.bf16.gmra.mrb[16].mxu1 %vm273_vm1, %v1148_v24  ;;  %1041 = vmatmul.mubr.msk.bf16.gmra.mrb[16].mxu0 %vm273_vm1, %v1149_v25 }
  0x4b   : > { %537 = vmatprep.mubr.bf16.mxu1 %v1224_v4  ;;  %713 = vmatprep.mubr.bf16.mxu0 %v1224_v4 }
  0x52   : > { %1015 = vmatmul.mubr.msk.bf16.gmra.mrb[20].mxu1 %vm273_vm1, %v1150_v26  ;;  %1042 = vmatmul.mubr.msk.bf16.gmra.mrb[20].mxu0 %vm273_vm1, %v1151_v27 }
  0xe5   : > { %v333_v28 = vpop.f32.mrb[0].mxu1 }
  0xe6   : > { %v335_v29 = vpop.f32.mrb[1].mxu1 }
  0xe7   : > { %v337_v30 = vpop.f32.mrb[2].mxu1 }
  0xe8   : > { %v339_v31 = vpop.f32.mrb[3].mxu1 }
  0xed   : > { %v343_v32 = vpop.f32.mrb[4].mxu1 }
  0xee   : > { %v345_v33 = vpop.f32.mrb[5].mxu1 }
  0xef   : > { %v347_v34 = vpop.f32.mrb[6].mxu1 }
  0xf0   : > { %v349_v35 = vpop.f32.mrb[7].mxu1 }
  0xf5   : > { %v353_v37 = vpop.f32.mrb[8].mxu1 }
  0xf6   : > { %v355_v38 = vpop.f32.mrb[9].mxu1 }
  0xf7   : > { %v357_v40 = vpop.f32.mrb[10].mxu1 }
  0xf8   : > { %v359_v41 = vpop.f32.mrb[11].mxu1 }
  0xfd   : > { %v665_v44 = vpop.f32.mrb[0].mxu0 }
  0xfe   : > { %v1346_v46 = vadd.f32 %v665_v44, %v333_v28  ;;  %v667_v47 = vpop.f32.mrb[1].mxu0 }
  0xff   : > { %v1061_v48 = vadd.f32 %v667_v47, %v335_v29  ;;  %v669_v49 = vpop.f32.mrb[2].mxu0  ;;  %v1366_v29 = vrot.slane %v748_v43, %v752_v18 }
 0x100   : > { %v1348_v50 = vadd.f32 %v669_v49, %v337_v30  ;;  %v671_v51 = vpop.f32.mrb[3].mxu0 }
 0x101   : > { %v761_v52 = vadd.f32 %v1061_v48, %v1344_v45  ;;  %v1063_v53 = vadd.f32 %v671_v51, %v339_v31 }
 0x102   : > { %v762_v48 = vadd.f32 %v1348_v50, %v1366_v29 }
 0x103   : > { %v1043_v54 = vmul.f32 -1.442695, %v761_v52  ;;  %v763_v55 = vadd.f32 %v1063_v53, %v1344_v45 }
 0x105   : > { %1152 = vpow2.f32 %v1043_v54  ;;  %v1044_v56 = vmul.f32 -1.442695, %v763_v55  ;;  %v675_v57 = vpop.f32.mrb[4].mxu0 }
 0x106   : > { %v1352_v58 = vadd.f32 %v675_v57, %v343_v32  ;;  %v677_v59 = vpop.f32.mrb[5].mxu0 }
 0x107   : > { %1154 = vpow2.f32 %v1044_v56  ;;  %v1065_v60 = vadd.f32 %v677_v59, %v345_v33  ;;  %v679_v61 = vpop.f32.mrb[6].mxu0 }
 0x108   : > { %v1354_v62 = vadd.f32 %v679_v61, %v347_v34  ;;  %v681_v63 = vpop.f32.mrb[7].mxu0 }
 0x109   : > { %v765_v0 = vadd.f32 %v1065_v60, %v1344_v45  ;;  %v1067_v1 = vadd.f32 %v681_v63, %v349_v35 }
 0x10b   : > { %v1045_v2 = vmul.f32 -1.442695, %v765_v0  ;;  %v767_v3 = vadd.f32 %v1067_v1, %v1344_v45 }
 0x10d   : > { %1156 = vpow2.f32 %v1045_v2  ;;  %v1046_v4 = vmul.f32 -1.442695, %v767_v3  ;;  %v685_v5 = vpop.f32.mrb[8].mxu0 }
 0x10e   : > { %v1358_v6 = vadd.f32 %v685_v5, %v353_v37  ;;  %v687_v7 = vpop.f32.mrb[9].mxu0  ;;  %v764_v5 = vadd.f32 %v1352_v58, %v1366_v29 }
 0x10f   : > { %v1153_v8 = vpop.eup %1152  ;;  %1158 = vpow2.f32 %v1046_v4  ;;  %v1069_v9 = vadd.f32 %v687_v7, %v355_v38  ;;  %v689_v10 = vpop.f32.mrb[10].mxu0 }
 0x110   : > { %v820_v11 = vadd.f32 1.0, %v1153_v8  ;;  %v1360_v12 = vadd.f32 %v689_v10, %v357_v40  ;;  %v691_v13 = vpop.f32.mrb[11].mxu0  ;;  %v760_v40 = vadd.f32 %v1346_v46, %v1366_v29 }
 0x111   : > { %v1155_v14 = vpop.eup %1154  ;;  %v769_v15 = vadd.f32 %v1069_v9, %v1344_v45  ;;  %v1071_v16 = vadd.f32 %v691_v13, %v359_v41  ;;  %v766_v13 = vadd.f32 %v1354_v62, %v1366_v29 }
 0x112   : > { %1160 = vrcp.f32 %v820_v11  ;;  %v821_v17 = vadd.f32 1.0, %v1155_v14 }
 0x113   : > { %v1047_v19 = vmul.f32 -1.442695, %v769_v15  ;;  %v771_v20 = vadd.f32 %v1071_v16, %v1344_v45 }
 0x114   : > { %1162 = vrcp.f32 %v821_v17 }
 0x115   : > { %v519_v21 = vpop.f32.mrb[12].mxu1  ;;  %1164 = vpow2.f32 %v1047_v19  ;;  %v1048_v22 = vmul.f32 -1.442695, %v771_v20  ;;  %v695_v23 = vpop.f32.mrb[12].mxu0 }
 0x116   : > { %v521_v24 = vpop.f32.mrb[13].mxu1  ;;  %v1364_v25 = vadd.f32 %v695_v23, %v519_v21  ;;  %v697_v26 = vpop.f32.mrb[13].mxu0 }
 0x117   : > { %v523_v27 = vpop.f32.mrb[14].mxu1  ;;  %v1157_v28 = vpop.eup %1156  ;;  %1166 = vpow2.f32 %v1048_v22  ;;  %v1073_v30 = vadd.f32 %v697_v26, %v521_v24 }
 0x118   : > { %v699_v31 = vpop.f32.mrb[14].mxu0  ;;  %v525_v32 = vpop.f32.mrb[15].mxu1  ;;  %v822_v33 = vadd.f32 1.0, %v1157_v28 }
 0x119   : > { %v1369_v34 = vadd.f32 %v699_v31, %v523_v27  ;;  %v701_v35 = vpop.f32.mrb[15].mxu0  ;;  %v1159_v36 = vpop.eup %1158  ;;  %v773_v37 = vadd.f32 %v1073_v30, %v1344_v45 }
 0x11a   : > { %v1075_v38 = vadd.f32 %v701_v35, %v525_v32  ;;  %1168 = vrcp.f32 %v822_v33  ;;  %v823_v39 = vadd.f32 1.0, %v1159_v36  ;;  %v768_v33 = vadd.f32 %v1358_v6, %v1366_v29 }
 0x11b   : > { %v1049_v41 = vmul.f32 -1.442695, %v773_v37 }
 0x11c   : > { %v775_v42 = vadd.f32 %v1075_v38, %v1344_v45  ;;  %v1161_v43 = vpop.eup %1160  ;;  %1170 = vrcp.f32 %v823_v39  ;;  %v770_v39 = vadd.f32 %v1360_v12, %v1366_v29 }
 0x11d   : > { %v529_v44 = vpop.f32.mrb[16].mxu1  ;;  %v856_v47 = vmul.f32 %v1161_v43, %v760_v40  ;;  %1172 = vpow2.f32 %v1049_v41  ;;  %v705_v51 = vpop.f32.mrb[16].mxu0 }
 0x11e   : > { %v1050_v49 = vmul.f32 -1.442695, %v775_v42  ;;  %v531_v46 = vpop.f32.mrb[17].mxu1  ;;  %v1163_v52 = vpop.eup %1162  ;;  %v1382_v53 = vadd.f32 %v705_v51, %v529_v44 }
 0x11f   : > { %v707_v54 = vpop.f32.mrb[17].mxu0  ;;  %v533_v55 = vpop.f32.mrb[18].mxu1  ;;  %868 = vst [vmem:[%s1378_s4] sm:$0xff] %v856_v47  ;;  %v857_v57 = vmul.f32 %v1163_v52, %v762_v48  ;;  %v772_v47 = vadd.f32 %v1364_v25, %v1366_v29 }
 0x120   : > { %v1165_v56 = vpop.eup %1164  ;;  %1174 = vpow2.f32 %v1050_v49  ;;  %v1077_v59 = vadd.f32 %v707_v54, %v531_v46  ;;  %v709_v60 = vpop.f32.mrb[18].mxu0  ;;  %v774_v49 = vadd.f32 %v1369_v34, %v1366_v29  ;;  %v776_v25 = vadd.f32 %v1382_v53, %v1366_v29 }
 0x121   : > { %v535_v61 = vpop.f32.mrb[19].mxu1  ;;  %v824_v63 = vadd.f32 1.0, %v1165_v56  ;;  %v1385_v0 = vadd.f32 %v709_v60, %v533_v55  ;;  %v711_v50 = vpop.f32.mrb[19].mxu0  ;;  %869 = vst [vmem:[%s1378_s4 + $0x8] sm:$0xff] %v857_v57 }
 0x122   : > { %v1167_v1 = vpop.eup %1166  ;;  %v777_v2 = vadd.f32 %v1077_v59, %v1344_v45  ;;  %v1079_v3 = vadd.f32 %v711_v50, %v535_v61 }
 0x123   : > { %1176 = vrcp.f32 %v824_v63  ;;  %v825_v4 = vadd.f32 1.0, %v1167_v1  ;;  %v778_v34 = vadd.f32 %v1385_v0, %v1366_v29 }
 0x124   : > { %v1051_v7 = vmul.f32 -1.442695, %v777_v2  ;;  %v779_v8 = vadd.f32 %v1079_v3, %v1344_v45  ;;  %v1169_v9 = vpop.eup %1168 }
 0x125   : > { %1178 = vrcp.f32 %v825_v4  ;;  %v539_v10 = vpop.f32.mrb[20].mxu1  ;;  %v858_v11 = vmul.f32 %v1169_v9, %v764_v5  ;;  %v715_v15 = vpop.f32.mrb[20].mxu0 }
 0x126   : > { %1180 = vpow2.f32 %v1051_v7  ;;  %v1052_v14 = vmul.f32 -1.442695, %v779_v8  ;;  %v541_v16 = vpop.f32.mrb[21].mxu1  ;;  %v1171_v17 = vpop.eup %1170  ;;  %v1080_v18 = vadd.f32 %v715_v15, %v539_v10 }
 0x127   : > { %v717_v19 = vpop.f32.mrb[21].mxu0  ;;  %v543_v58 = vpop.f32.mrb[22].mxu1  ;;  %870 = vst [vmem:[%s1378_s4 + $0x10] sm:$0xff] %v858_v11  ;;  %v859_v21 = vmul.f32 %v1171_v17, %v766_v13 }
 0x128   : > { %v1173_v20 = vpop.eup %1172  ;;  %1182 = vpow2.f32 %v1052_v14  ;;  %v1081_v22 = vadd.f32 %v717_v19, %v541_v16  ;;  %v719_v23 = vpop.f32.mrb[22].mxu0  ;;  %v780_v63 = vadd.f32 %v1080_v18, %v1366_v29 }
 0x129   : > { %v545_v24 = vpop.f32.mrb[23].mxu1  ;;  %v826_v26 = vadd.f32 1.0, %v1173_v20  ;;  %v1082_v27 = vadd.f32 %v719_v23, %v543_v58  ;;  %v721_v28 = vpop.f32.mrb[23].mxu0  ;;  %871 = vst [vmem:[%s1378_s4 + $0x18] sm:$0xff] %v859_v21 }
 0x12a   : > { %v1175_v62 = vpop.eup %1174  ;;  %v781_v30 = vadd.f32 %v1081_v22, %v1344_v45  ;;  %v1083_v31 = vadd.f32 %v721_v28, %v545_v24 }
 0x12b   : > { %1184 = vrcp.f32 %v826_v26  ;;  %v827_v32 = vadd.f32 1.0, %v1175_v62  ;;  %v782_v2 = vadd.f32 %v1082_v27, %v1366_v29 }
 0x12c   : > { %v1053_v35 = vmul.f32 -1.442695, %v781_v30  ;;  %v783_v36 = vadd.f32 %v1083_v31, %v1344_v45 }
 0x12d   : > { %v1177_v37 = vpop.eup %1176  ;;  %1186 = vrcp.f32 %v827_v32 }
 0x12e   : > { %v860_v38 = vmul.f32 %v1177_v37, %v768_v33  ;;  %1188 = vpow2.f32 %v1053_v35  ;;  %v1054_v40 = vmul.f32 -1.442695, %v783_v36 }
 0x12f   : > { %v1179_v41 = vpop.eup %1178 }
 0x130   : > { %v1181_v42 = vpop.eup %1180  ;;  %872 = vst [vmem:[%s1378_s4 + $0x20] sm:$0xff] %v860_v38  ;;  %v861_v43 = vmul.f32 %v1179_v41, %v770_v39  ;;  %1190 = vpow2.f32 %v1054_v40 }
 0x131   : > { %v828_v44 = vadd.f32 1.0, %v1181_v42 }
 0x132   : > { %v1183_v6 = vpop.eup %1182  ;;  %873 = vst [vmem:[%s1378_s4 + $0x28] sm:$0xff] %v861_v43 }
 0x133   : > { %1192 = vrcp.f32 %v828_v44  ;;  %v829_v45 = vadd.f32 1.0, %v1183_v6 }
 0x135   : > { %v1185_v48 = vpop.eup %1184  ;;  %1194 = vrcp.f32 %v829_v45 }
 0x136   : > { %v862_v12 = vmul.f32 %v1185_v48, %v772_v47 }
 0x137   : > { %v1187_v51 = vpop.eup %1186 }
 0x138   : > { %v1189_v46 = vpop.eup %1188  ;;  %874 = vst [vmem:[%s1378_s4 + $0x30] sm:$0xff] %v862_v12  ;;  %v863_v52 = vmul.f32 %v1187_v51, %v774_v49 }
 0x139   : > { %v830_v54 = vadd.f32 1.0, %v1189_v46 }
 0x13a   : > { %v1191_v55 = vpop.eup %1190  ;;  %875 = vst [vmem:[%s1378_s4 + $0x38] sm:$0xff] %v863_v52 }
 0x13b   : > { %1196 = vrcp.f32 %v830_v54  ;;  %v831_v56 = vadd.f32 1.0, %v1191_v55 }
 0x13d   : > { %v1193_v57 = vpop.eup %1192  ;;  %1198 = vrcp.f32 %v831_v56 }
 0x13e   : > { %v864_v59 = vmul.f32 %v1193_v57, %v776_v25 }
 0x13f   : > { %v1195_v60 = vpop.eup %1194 }
 0x140   : > { %876 = vst [vmem:[%s1378_s4 + $0x40] sm:$0xff] %v864_v59  ;;  %v865_v61 = vmul.f32 %v1195_v60, %v778_v34 }
 0x142   : > { %877 = vst [vmem:[%s1378_s4 + $0x48] sm:$0xff] %v865_v61 }
 0x145   : > { %v1197_v50 = vpop.eup %1196 }
 0x146   : > { %v866_v1 = vmul.f32 %v1197_v50, %v780_v63 }
 0x147   : > { %v1199_v3 = vpop.eup %1198 }
 0x148   : > { %878 = vst [vmem:[%s1378_s4 + $0x50] sm:$0xff] %v866_v1  ;;  %v867_v53 = vmul.f32 %v1199_v3, %v782_v2 }
 0x14a   : > { %879 = vst [vmem:[%s1378_s4 + $0x58] sm:$0xff] %v867_v53 }
 0x14b PF: > { %s13_s14 = sadd.s32 1, %s1222_s14   ;;  %s1433_s12 = smov %s1218_s13 }
 0x14c   : > { %p10_p5 = scmp.ge.s32.totalorder %s13_s14, 4   ;;  %s1434_s13 = smov %s1436_s15 }
 0x14e   :  { %12 = sbr.rel (!%p10_p5) target bundleno = 2 (0x2), region = 67 }

</bundles_post_ra>
